<compile_context>
chip_gen: v7x
topology: tpu7x:2x2x1
jax: 0.10.0
libtpu: 0.0.40
codegen_flags: <defaults>
</compile_context>

<pallas_src>
import functools

import jax
import jax.numpy as jnp
from jax import lax
from jax.experimental import pallas as pl
from jax.experimental.pallas import tpu as pltpu

_INV_SQRT2 = 0.7071067811865476


def _gelu_exact(x):
    # nn.GELU() default = exact erf formulation (multiply, not divide: single VPU slot)
    return 0.5 * x * (1.0 + lax.erf(x * _INV_SQRT2))


def _round_up(a, b):
    return (a + b - 1) // b * b


def _patch_embed_kernel(eps, inv_c, precision, x_ref, w_ref, b_ref, g_ref, bt_ref, o_ref):
    # x_ref: (TM, K) streamed patch tile; w_ref: (K, C) resident weight; b/g/bt: (1, C)
    y = jnp.dot(x_ref[...], w_ref[...],
                preferred_element_type=jnp.float32,
                precision=precision) + b_ref[...]
    # One-pass LayerNorm stats: both cross-lane reductions issue back-to-back (XLU).
    s1 = jnp.sum(y, axis=-1, keepdims=True)
    s2 = jnp.sum(y * y, axis=-1, keepdims=True)
    mu = s1 * inv_c
    var = jnp.maximum(s2 * inv_c - mu * mu, 0.0)
    yn = (y - mu) * lax.rsqrt(var + eps) * g_ref[...] + bt_ref[...]
    o_ref[...] = _gelu_exact(yn).astype(o_ref.dtype)


def patch_embed_3d(x, weight, bias, gamma, beta, *, patch_size, eps=1e-5,
                   token_tile=None, compute_dtype=None, channels_last=False):
    """x: (B, Cin, D, H, W); weight: (C, Cin, pd, ph, pw); bias/gamma/beta: (C,) or (1, C).
    Returns (B, C, D/pd, H/ph, W/pw) (or channels-last if channels_last=True)."""
    B, Cin, D, H, W = x.shape
    pd, ph, pw = patch_size
    C = weight.shape[0]
    assert D % pd == 0 and H % ph == 0 and W % pw == 0, "input size must match patch grid"
    nd, nh, nw = D // pd, H // ph, W // pw
    K = Cin * pd * ph * pw
    ntok = B * nd * nh * nw

    # Streaming dtype for patches / projection weight (bf16 halves HBM read volume).
    stream_dtype = jnp.dtype(compute_dtype) if compute_dtype is not None else jnp.dtype(x.dtype)
    itemsize = stream_dtype.itemsize
    out_itemsize = jnp.dtype(x.dtype).itemsize
    sub = 8 if itemsize >= 4 else (16 if itemsize == 2 else 32)

    # im2col for a stride==kernel conv (wrapper-side layout plumbing, not compute).
    # TODO(synk): at scale this is an extra full-input HBM pass; a (B, nd, nh) grid with
    # block (1, Cin, pd, ph, W) could fold patchification into the kernel.
    xp = x.reshape(B, Cin, nd, pd, nh, ph, nw, pw)
    xp = xp.transpose(0, 2, 4, 6, 1, 3, 5, 7)            # (B, nd, nh, nw, Cin, pd, ph, pw)
    patches = xp.reshape(ntok, K)
    w_flat = weight.reshape(C, K).T                       # (K, C), matches patch flattening

    if compute_dtype is not None:
        patches = patches.astype(stream_dtype)
        w_flat = w_flat.astype(stream_dtype)

    # Matmul precision: HIGHEST for f32 streaming (parity with a full-precision conv);
    # default when already streaming bf16 operands.
    if compute_dtype is None and jnp.dtype(x.dtype) == jnp.float32:
        precision = lax.Precision.HIGHEST
    else:
        precision = lax.Precision.DEFAULT

    # Bias / LN params stay f32 (tiny, VMEM-resident; exact add against the f32 accumulator).
    bias = jnp.asarray(bias, jnp.float32).reshape(1, C)
    gamma = jnp.asarray(gamma, jnp.float32).reshape(1, C)
    beta = jnp.asarray(beta, jnp.float32).reshape(1, C)

    # --- shape-aware token tile -------------------------------------------------------------
    if token_tile is None:
        # >= ~2 MiB of streamed bytes per grid step to amortize ~0.35us/step pipeline overhead
        target = (2 * 1024 * 1024) // max(1, (K + C) * itemsize)
        tm = max(256, (target // 256) * 256)              # multiple of 256 (MXU-friendly)
        tm = min(tm, 4096)
    else:
        tm = int(token_tile)
    tm = min(tm, _round_up(ntok, sub))
    tm = _round_up(tm, sub)
    # Prefer a tile that divides the (sublane-aligned) token count -> skip the jnp.pad pass.
    ntok_aligned = _round_up(ntok, sub)
    if ntok_aligned % tm != 0:
        cand = tm
        floor = max(sub, tm // 2)
        while cand >= floor:
            if ntok_aligned % cand == 0:
                tm = cand
                break
            cand -= sub
    ntok_p = _round_up(ntok, tm)
    if ntok_p != ntok:
        patches = jnp.pad(patches, ((0, ntok_p - ntok), (0, 0)))
    grid = (ntok_p // tm,)

    # --- compiler params / cost estimate ------------------------------------------------------
    vmem_est = (2 * tm * K * itemsize                 # double-buffered patch tiles
                + K * C * itemsize                    # resident projection weight
                + 3 * C * 4                           # bias / gamma / beta
                + 2 * tm * C * out_itemsize           # double-buffered output tiles
                + 4 * tm * C * 4)                     # in-flight f32 intermediates
    cp_kwargs = dict(dimension_semantics=("parallel",))
    if vmem_est > 12 * 1024 * 1024:                   # above v5e's 16 MiB scoped default -> raise
        cp_kwargs["vmem_limit_bytes"] = min(int(vmem_est * 3 // 2), 48 * 1024 * 1024)
    compiler_params = pltpu.CompilerParams(**cp_kwargs)

    cost = pl.CostEstimate(
        flops=2 * ntok_p * K * C,
        transcendentals=ntok_p * C,                   # one erf per output element
        bytes_accessed=itemsize * (ntok_p * K + K * C) + out_itemsize * ntok_p * C,
    )

    kernel = functools.partial(_patch_embed_kernel, float(eps), float(1.0 / C), precision)

    out = pl.pallas_call(
        kernel,
        out_shape=jax.ShapeDtypeStruct((ntok_p, C), x.dtype),
        grid=grid,
        in_specs=[
            pl.BlockSpec((tm, K), lambda i: (i, 0)),      # streamed token tiles
            # constant index maps -> blocks stay resident in VMEM, no per-step re-DMA
            pl.BlockSpec((K, C), lambda i: (0, 0)),       # projection weight
            pl.BlockSpec((1, C), lambda i: (0, 0)),       # conv bias
            pl.BlockSpec((1, C), lambda i: (0, 0)),       # LN gamma
            pl.BlockSpec((1, C), lambda i: (0, 0)),       # LN beta
        ],
        out_specs=pl.BlockSpec((tm, C), lambda i: (i, 0)),  # lane-dense (C last, >=128)
        compiler_params=compiler_params,
        cost_estimate=cost,
    )(patches, w_flat, bias, gamma, beta)

    out = out[:ntok].reshape(B, nd, nh, nw, C)
    if channels_last:
        return out                                        # skip the extra HBM permute pass
    return out.transpose(0, 4, 1, 2, 3)                   # (B, C, nd, nh, nw), module semantics


def patch_embed_3d_reference(x, weight, bias, gamma, beta, *, patch_size, eps=1e-5):
    """Pure-JAX reference using a real 3D convolution (full precision)."""
    C = weight.shape[0]
    y = lax.conv_general_dilated(
        x, weight, window_strides=patch_size, padding="VALID",
        dimension_numbers=("NCDHW", "OIDHW", "NCDHW"),
        precision=lax.Precision.HIGHEST)
    y = y + bias.reshape(1, C, 1, 1, 1)
    y = jnp.moveaxis(y, 1, -1)                             # (B, nd, nh, nw, C)
    mu = jnp.mean(y, axis=-1, keepdims=True)
    var = jnp.mean((y - mu) ** 2, axis=-1, keepdims=True)
    y = (y - mu) / jnp.sqrt(var + eps) * gamma.reshape(-1) + beta.reshape(-1)
    y = jnp.moveaxis(y, -1, 1)                             # back to (B, C, nd, nh, nw)
    return _gelu_exact(y)


if __name__ == "__main__":
    B, Cin = 2, 1
    img = (16, 16, 16)
    patch = (4, 4, 4)
    C = 128  # embed_dim: multiple of 128 -> lane-dense unmasked stores

    key = jax.random.PRNGKey(0)
    kx, kw, kb, kg, kbt = jax.random.split(key, 5)
    x = jax.random.normal(kx, (B, Cin) + img, jnp.float32)
    weight = 0.05 * jax.random.normal(kw, (C, Cin) + patch, jnp.float32)
    bias = 0.02 * jax.random.normal(kb, (C,), jnp.float32)
    gamma = 1.0 + 0.1 * jax.random.normal(kg, (C,), jnp.float32)
    beta = 0.1 * jax.random.normal(kbt, (C,), jnp.float32)

    y_ref = patch_embed_3d_reference(x, weight, bias, gamma, beta, patch_size=patch)

    # f32 streaming + HIGHEST matmul precision: tight parity with the full-precision conv.
    y = patch_embed_3d(x, weight, bias, gamma, beta, patch_size=patch)
    y = jax.block_until_ready(y)
    assert y.shape == (B, C, 4, 4, 4), y.shape
    assert jnp.allclose(y, y_ref, atol=1e-3, rtol=1e-3), \
        float(jnp.max(jnp.abs(y - y_ref)))

    # bf16-streamed variant (halved HBM read volume of the dominant operand), f32 accumulation.
    y_bf16 = patch_embed_3d(x, weight, bias, gamma, beta, patch_size=patch,
                            compute_dtype=jnp.bfloat16)
    y_bf16 = jax.block_until_ready(y_bf16)
    assert jnp.allclose(y_bf16, y_ref, atol=5e-2, rtol=5e-2), \
        float(jnp.max(jnp.abs(y_bf16 - y_ref)))

    print("KERNEL_OK")
</pallas_src>

<mosaic_0001>
module attributes {stable_mosaic.version = 11 : i64} {
  func.func @_patch_embed_kernel(%arg0: i32, %arg1: memref<128x64xf32, #tpu.memory_space<vmem>>, %arg2: memref<64x128xf32, #tpu.memory_space<vmem>>, %arg3: memref<1x128xf32, #tpu.memory_space<vmem>>, %arg4: memref<1x128xf32, #tpu.memory_space<vmem>>, %arg5: memref<1x128xf32, #tpu.memory_space<vmem>>, %arg6: memref<128x128xf32, #tpu.memory_space<vmem>>) attributes {dimension_semantics = [#tpu.dimension_semantics<parallel>], iteration_bounds = array<i64: 1>, scalar_prefetch = 0 : i64, scratch_operands = 0 : i64, tpu.core_type = #tpu.core_type<tc>, window_params = [{transform_indices = @transform_0, window_bounds = array<i64: 128, 64>}, {pipeline_mode = #tpu.pipeline_mode<synchronous>, transform_indices = @transform_1, window_bounds = array<i64: 64, 128>}, {pipeline_mode = #tpu.pipeline_mode<synchronous>, transform_indices = @transform_2, window_bounds = array<i64: 1, 128>}, {pipeline_mode = #tpu.pipeline_mode<synchronous>, transform_indices = @transform_3, window_bounds = array<i64: 1, 128>}, {pipeline_mode = #tpu.pipeline_mode<synchronous>, transform_indices = @transform_4, window_bounds = array<i64: 1, 128>}, {transform_indices = @transform_5, window_bounds = array<i64: 128, 128>}]} {
    %c0 = arith.constant 0 : index
    %c0_0 = arith.constant 0 : index
    %0 = vector.load %arg1[%c0, %c0_0] : memref<128x64xf32, #tpu.memory_space<vmem>>, vector<128x64xf32>
    %c0_1 = arith.constant 0 : index
    %c0_2 = arith.constant 0 : index
    %1 = vector.load %arg2[%c0_1, %c0_2] : memref<64x128xf32, #tpu.memory_space<vmem>>, vector<64x128xf32>
    %cst = arith.constant dense<0.000000e+00> : vector<128x128xf32>
    %2 = tpu.matmul %0, %1, %cst {dimension_numbers = #tpu.dot_dimension_numbers<[1], [0], [0], [1], [0, 0, 1, 1], [], []>, precision = #tpu.contract_precision<fp32>} : vector<128x64xf32>, vector<64x128xf32>, vector<128x128xf32> -> vector<128x128xf32>
    %c0_3 = arith.constant 0 : index
    %c0_4 = arith.constant 0 : index
    %3 = vector.load %arg3[%c0_3, %c0_4] : memref<1x128xf32, #tpu.memory_space<vmem>>, vector<1x128xf32>
    %4 = vector.broadcast %3 : vector<1x128xf32> to vector<128x128xf32>
    %5 = arith.addf %2, %4 : vector<128x128xf32>
    %cst_5 = arith.constant dense<0.000000e+00> : vector<128xf32>
    %6 = vector.multi_reduction <add>, %5, %cst_5 [1] : vector<128x128xf32> to vector<128xf32>
    %7 = vector.shape_cast %6 : vector<128xf32> to vector<128x1xf32>
    %8 = arith.mulf %5, %5 : vector<128x128xf32>
    %cst_6 = arith.constant dense<0.000000e+00> : vector<128xf32>
    %9 = vector.multi_reduction <add>, %8, %cst_6 [1] : vector<128x128xf32> to vector<128xf32>
    %10 = vector.shape_cast %9 : vector<128xf32> to vector<128x1xf32>
    %cst_7 = arith.constant 7.812500e-03 : f32
    %11 = vector.broadcast %cst_7 : f32 to vector<128x1xf32>
    %12 = arith.mulf %7, %11 : vector<128x1xf32>
    %cst_8 = arith.constant 7.812500e-03 : f32
    %13 = vector.broadcast %cst_8 : f32 to vector<128x1xf32>
    %14 = arith.mulf %10, %13 : vector<128x1xf32>
    %15 = arith.mulf %12, %12 : vector<128x1xf32>
    %16 = arith.subf %14, %15 : vector<128x1xf32>
    %cst_9 = arith.constant 0.000000e+00 : f32
    %17 = vector.broadcast %cst_9 : f32 to vector<128x1xf32>
    %18 = arith.maximumf %16, %17 : vector<128x1xf32>
    %19 = vector.broadcast %12 : vector<128x1xf32> to vector<128x128xf32>
    %20 = arith.subf %5, %19 : vector<128x128xf32>
    %cst_10 = arith.constant 9.99999974E-6 : f32
    %21 = vector.broadcast %cst_10 : f32 to vector<128x1xf32>
    %22 = arith.addf %18, %21 : vector<128x1xf32>
    %23 = math.rsqrt %22 : vector<128x1xf32>
    %24 = vector.broadcast %23 : vector<128x1xf32> to vector<128x128xf32>
    %25 = arith.mulf %20, %24 : vector<128x128xf32>
    %c0_11 = arith.constant 0 : index
    %c0_12 = arith.constant 0 : index
    %26 = vector.load %arg4[%c0_11, %c0_12] : memref<1x128xf32, #tpu.memory_space<vmem>>, vector<1x128xf32>
    %27 = vector.broadcast %26 : vector<1x128xf32> to vector<128x128xf32>
    %28 = arith.mulf %25, %27 : vector<128x128xf32>
    %c0_13 = arith.constant 0 : index
    %c0_14 = arith.constant 0 : index
    %29 = vector.load %arg5[%c0_13, %c0_14] : memref<1x128xf32, #tpu.memory_space<vmem>>, vector<1x128xf32>
    %30 = vector.broadcast %29 : vector<1x128xf32> to vector<128x128xf32>
    %31 = arith.addf %28, %30 : vector<128x128xf32>
    %cst_15 = arith.constant 5.000000e-01 : f32
    %32 = vector.broadcast %cst_15 : f32 to vector<128x128xf32>
    %33 = arith.mulf %32, %31 : vector<128x128xf32>
    %cst_16 = arith.constant 0.707106769 : f32
    %34 = vector.broadcast %cst_16 : f32 to vector<128x128xf32>
    %35 = arith.mulf %31, %34 : vector<128x128xf32>
    %36 = math.erf %35 : vector<128x128xf32>
    %cst_17 = arith.constant 1.000000e+00 : f32
    %37 = vector.broadcast %cst_17 : f32 to vector<128x128xf32>
    %38 = arith.addf %37, %36 : vector<128x128xf32>
    %39 = arith.mulf %33, %38 : vector<128x128xf32>
    %c0_18 = arith.constant 0 : index
    %c0_19 = arith.constant 0 : index
    %40 = vector.load %arg6[%c0_18, %c0_19] : memref<128x128xf32, #tpu.memory_space<vmem>>, vector<128x128xf32>
    tpu.vector_store %arg6[%c0_18, %c0_19], %39 {strides = array<i32>} : memref<128x128xf32, #tpu.memory_space<vmem>>, vector<128x128xf32>,
    return
  }
  func.func @transform_0(%arg0: i32) -> (i32, i32) {
    %c0_i32 = arith.constant 0 : i32
    %c0_i32_0 = arith.constant 0 : i32
    return %arg0, %c0_i32 : i32, i32
  }
  func.func @transform_1(%arg0: i32) -> (i32, i32) {
    %c0_i32 = arith.constant 0 : i32
    %c0_i32_0 = arith.constant 0 : i32
    %c0_i32_1 = arith.constant 0 : i32
    return %c0_i32, %c0_i32_0 : i32, i32
  }
  func.func @transform_2(%arg0: i32) -> (i32, i32) {
    %c0_i32 = arith.constant 0 : i32
    %c0_i32_0 = arith.constant 0 : i32
    %c0_i32_1 = arith.constant 0 : i32
    return %c0_i32, %c0_i32_0 : i32, i32
  }
  func.func @transform_3(%arg0: i32) -> (i32, i32) {
    %c0_i32 = arith.constant 0 : i32
    %c0_i32_0 = arith.constant 0 : i32
    %c0_i32_1 = arith.constant 0 : i32
    return %c0_i32, %c0_i32_0 : i32, i32
  }
  func.func @transform_4(%arg0: i32) -> (i32, i32) {
    %c0_i32 = arith.constant 0 : i32
    %c0_i32_0 = arith.constant 0 : i32
    %c0_i32_1 = arith.constant 0 : i32
    return %c0_i32, %c0_i32_0 : i32, i32
  }
  func.func @transform_5(%arg0: i32) -> (i32, i32) {
    %c0_i32 = arith.constant 0 : i32
    %c0_i32_0 = arith.constant 0 : i32
    return %arg0, %c0_i32 : i32, i32
  }
}

</mosaic_0001>

<bundles_post_ra>
// kernel: tpu_custom_call.1
= control target key start
LH: loop header
LB: loop body
LE: loop exit
PB: predicated region body
PF: predicated region fallthrough
CT: control target
= control target key end

     0   :  { %vm52_vm0 = vcmask 523264   ;;  %s3060_s0 = inlined_call_operand.vmem [shape: f32[128,64], index: 0, kind: input, shape index: {}]   ;;  %s3061_s1 = inlined_call_operand.vmem [shape: f32[64,128], index: 1, kind: input, shape index: {}]   ;;  %s3062_s2 = inlined_call_operand.vmem [shape: f32[1,128], index: 2, kind: input, shape index: {}]   ;;  %s3063_s3 = inlined_call_operand.vmem [shape: f32[1,128], index: 3, kind: input, shape index: {}]   ;;  %s3064_s4 = inlined_call_operand.vmem [shape: f32[1,128], index: 4, kind: input, shape index: {}]   ;;  %s3065_s5 = inlined_call_operand.hbm [shape: f32[128,128], index: 5, kind: output, shape index: {}]  }
   0x1   :  { %v37_v0 = vld [vmem:[%s3061_s1] sm:$0xff]  ;;  %v38_v1 = vld [vmem:[%s3061_s1 + $0x8] sm:$0xff]  ;;  %v2377_v2 = vld [vmem:[%s3061_s1 + $0x10] sm:$0xff] }
   0x2   :  { %v102_v3 = vand.u32 4294901760, %v37_v0  ;;  %v105_v4 = vand.u32 4294901760, %v38_v1  ;;  %v2382_v5 = vld [vmem:[%s3061_s1 + $0x18] sm:$0xff]  ;;  %v108_v6 = vand.u32 4294901760, %v2377_v2  ;;  %v2388_v7 = vld [vmem:[%s3061_s1 + $0x20] sm:$0xff]  ;;  %v2393_v8 = vld [vmem:[%s3061_s1 + $0x28] sm:$0xff] }
   0x3   :  { %v111_v9 = vand.u32 4294901760, %v2382_v5  ;;  %v114_v10 = vand.u32 4294901760, %v2388_v7  ;;  %v117_v11 = vand.u32 4294901760, %v2393_v8  ;;  %v2401_v12 = vld [vmem:[%s3061_s1 + $0x30] sm:$0xff]  ;;  %v2406_v13 = vld [vmem:[%s3061_s1 + $0x38] sm:$0xff]  ;;  %v21_v14 = vld [vmem:[%s3060_s0] sm:$0xff] }
   0x4   :  { %v2411_v15 = vpack.c.bf16 %v105_v4, %v102_v3  ;;  %v120_v16 = vand.u32 4294901760, %v2401_v12  ;;  %v123_v17 = vand.u32 4294901760, %v2406_v13  ;;  %v54_v18 = vsel %vm52_vm0, %v21_v14, 0  ;;  %v22_v19 = vld [vmem:[%s3060_s0 + $0x8] sm:$0xff]  ;;  %v23_v20 = vld [vmem:[%s3060_s0 + $0x10] sm:$0xff]  ;;  %v24_v21 = vld [vmem:[%s3060_s0 + $0x18] sm:$0xff] }
   0x5   :  { %v2429_v22 = vpack.c.bf16 %v111_v9, %v108_v6  ;;  %v2435_v23 = vpack.c.bf16 %v117_v11, %v114_v10  ;;  %v2437_v24 = vand.u32 4294901760, %v54_v18  ;;  %v57_v25 = vsel %vm52_vm0, %v22_v19, 0  ;;  %v25_v26 = vld [vmem:[%s3060_s0 + $0x20] sm:$0xff]  ;;  %v26_v31 = vld [vmem:[%s3060_s0 + $0x28] sm:$0xff] }
   0x6   :  { %2053 = vmatprep.subr.bf16.mxu1 %v2411_v15  ;;  %2101 = vmatprep.subr.bf16.mxu0 %v2411_v15  ;;  %v2449_v27 = vpack.c.bf16 %v123_v17, %v120_v16  ;;  %v2451_v28 = vand.u32 4294901760, %v57_v25  ;;  %v2453_v29 = vsub.f32 %v37_v0, %v102_v3  ;;  %v2455_v30 = vsub.f32 %v38_v1, %v105_v4 }
   0x7   :  { %2055 = vmatpush3.bf16.msra.mxu1 %v2411_v15  ;;  %2103 = vmatpush3.bf16.msra.mxu0 %v2411_v15  ;;  %v2463_v32 = vsub.f32 %v54_v18, %v2437_v24  ;;  %v60_v33 = vsel %vm52_vm0, %v23_v20, 0  ;;  %v63_v34 = vsel %vm52_vm0, %v24_v21, 0  ;;  %v66_v35 = vsel %vm52_vm0, %v25_v26, 0 }
   0x8   :  { %2057 = vmatprep.subr.bf16.mxu1 %v2429_v22  ;;  %2105 = vmatprep.subr.bf16.mxu0 %v2429_v22  ;;  %v2471_v36 = vsub.f32 %v57_v25, %v2451_v28  ;;  %v337_v37 = vand.u32 4294901760, %v2453_v29  ;;  %v344_v38 = vand.u32 4294901760, %v2455_v30  ;;  %v2475_v39 = vand.u32 4294901760, %v60_v33 }
   0x9   :  { %v176_v40 = vand.u32 4294901760, %v2463_v32  ;;  %v2478_v41 = vand.u32 4294901760, %v63_v34  ;;  %v2480_v42 = vand.u32 4294901760, %v66_v35  ;;  %v69_v43 = vsel %vm52_vm0, %v26_v31, 0 }
   0xa   :  { %v186_v44 = vand.u32 4294901760, %v2471_v36  ;;  %v338_v45 = vsub.f32 %v2453_v29, %v337_v37  ;;  %v345_v46 = vsub.f32 %v2455_v30, %v344_v38  ;;  %v2486_v47 = vpack.c.bf16 %v344_v38, %v337_v37 }
   0xb   :  { %10 = vsyncpa [#allocation3], 0  ;;  %2059 = vmatpush3.bf16.msra.mxu1 %v2429_v22  ;;  %2107 = vmatpush3.bf16.msra.mxu0 %v2429_v22  ;;  %v177_v48 = vsub.f32 %v2463_v32, %v176_v40  ;;  %v2492_v49 = vsub.f32 %v60_v33, %v2475_v39  ;;  %v2495_v50 = vsub.f32 %v63_v34, %v2478_v41  ;;  %v2497_v51 = vand.u32 4294901760, %v69_v43  ;;  %v27_v60 = vld [vmem:[%s3060_s0 + $0x30] sm:$0xff]  ;;  %v28_v61 = vld [vmem:[%s3060_s0 + $0x38] sm:$0xff] }
   0xc   :  { %2061 = vmatprep.subr.bf16.mxu1 %v2435_v23  ;;  %2109 = vmatprep.subr.bf16.mxu0 %v2435_v23  ;;  %v187_v52 = vsub.f32 %v2471_v36, %v186_v44  ;;  %v339_v53 = vand.u32 4294901760, %v338_v45  ;;  %v346_v54 = vand.u32 4294901760, %v345_v46  ;;  %v2505_v55 = vsub.f32 %v66_v35, %v2480_v42  ;;  %v30_v37 = vld [vmem:[%s3060_s0 + $0x48] sm:$0xff] }
   0xd   :  { %v178_v56 = vand.u32 4294901760, %v177_v48  ;;  %1948 = vmatprep.mubr.f32.mxu0 %v176_v40  ;;  %v196_v57 = vand.u32 4294901760, %v2492_v49  ;;  %v206_v58 = vand.u32 4294901760, %v2495_v50  ;;  %v2510_v59 = vsub.f32 %v69_v43, %v2497_v51 }
   0xe   :  { %v188_v62 = vand.u32 4294901760, %v187_v52  ;;  %v2068_v63 = vpack.c.bf16 %v346_v54, %v339_v53  ;;  %v216_v0 = vand.u32 4294901760, %v2505_v55  ;;  %v2522_v1 = vsub.f32 %v2377_v2, %v108_v6  ;;  %v31_v54 = vld [vmem:[%s3060_s0 + $0x50] sm:$0xff] }
   0xf   :  { %2063 = vmatpush3.bf16.msra.mxu1 %v2435_v23  ;;  %2111 = vmatpush3.bf16.msra.mxu0 %v2435_v23  ;;  %v197_v3 = vsub.f32 %v2492_v49, %v196_v57  ;;  %v2530_v4 = vsub.f32 %v2495_v50, %v206_v58  ;;  %v226_v14 = vand.u32 4294901760, %v2510_v59  ;;  %v2536_v18 = vsub.f32 %v2382_v5, %v111_v9  ;;  %v29_v5 = vld [vmem:[%s3060_s0 + $0x40] sm:$0xff] }
  0x10   :  { %2065 = vmatprep.subr.bf16.mxu1 %v2449_v27  ;;  %2113 = vmatprep.subr.bf16.mxu0 %v2449_v27  ;;  %v2543_v2 = vsub.f32 %v2505_v55, %v216_v0  ;;  %v351_v6 = vand.u32 4294901760, %v2522_v1  ;;  %v72_v19 = vsel %vm52_vm0, %v27_v60, 0  ;;  %v75_v20 = vsel %vm52_vm0, %v28_v61, 0 }
  0x11   :  { %1828 = vmatprep.mubr.f32.mxu1 %v178_v56  ;;  %v198_v9 = vand.u32 4294901760, %v197_v3  ;;  %v208_v21 = vand.u32 4294901760, %v2530_v4  ;;  %v2555_v25 = vsub.f32 %v2510_v59, %v226_v14  ;;  %v358_v26 = vand.u32 4294901760, %v2536_v18 }
  0x12   :  { %v218_v31 = vand.u32 4294901760, %v2543_v2  ;;  %v352_v33 = vsub.f32 %v2522_v1, %v351_v6  ;;  %v2560_v34 = vand.u32 4294901760, %v72_v19  ;;  %v2562_v35 = vand.u32 4294901760, %v75_v20 }
  0x13   :  { %2067 = vmatpush3.bf16.msra.mxu1 %v2449_v27  ;;  %2115 = vmatpush3.bf16.msra.mxu0 %v2449_v27  ;;  %v228_v38 = vand.u32 4294901760, %v2555_v25  ;;  %v359_v40 = vsub.f32 %v2536_v18, %v358_v26  ;;  %v2120_v43 = vpack.c.bf16 %v358_v26, %v351_v6  ;;  %v78_v45 = vsel %vm52_vm0, %v29_v5, 0  ;;  %v32_v5 = vld [vmem:[%s3060_s0 + $0x58] sm:$0xff] }
  0x14   :  { %2069 = vmatprep.subr.bf16.mxu1 %v2068_v63  ;;  %2117 = vmatprep.subr.bf16.mxu0 %v2486_v47  ;;  %v353_v46 = vand.u32 4294901760, %v352_v33  ;;  %v2574_v48 = vsub.f32 %v72_v19, %v2560_v34  ;;  %v2577_v52 = vsub.f32 %v75_v20, %v2562_v35  ;;  %v2579_v53 = vand.u32 4294901760, %v78_v45  ;;  %v33_v33 = vld [vmem:[%s3060_s0 + $0x60] sm:$0xff] }
  0x15   :  { %v360_v56 = vand.u32 4294901760, %v359_v40  ;;  %v81_v60 = vsel %vm52_vm0, %v30_v37, 0  ;;  %v2588_v61 = vsub.f32 %v2388_v7, %v114_v10  ;;  %v2593_v3 = vsub.f32 %v2393_v8, %v117_v11 }
  0x16   :  { %1829 = vmatmul.mubr.f32.vlgmr.msra.gmra.mrb[0].mxu1 %v188_v62  ;;  %1949 = vmatmul.mubr.f32.vlgmr.msra.gmra.mrb[0].mxu0 %v186_v44  ;;  %v236_v4 = vand.u32 4294901760, %v2574_v48  ;;  %v246_v2 = vand.u32 4294901760, %v2577_v52  ;;  %v2600_v6 = vsub.f32 %v78_v45, %v2579_v53  ;;  %v2602_v19 = vand.u32 4294901760, %v81_v60 }
  0x17   :  { %2071 = vmatpush3.bf16.msra.mxu1 %v2068_v63  ;;  %1831 = vmatprep.mubr.f32.mxu1 %v198_v9  ;;  %v2072_v7 = vpack.c.bf16 %v360_v56, %v353_v46  ;;  %v365_v10 = vand.u32 4294901760, %v2588_v61  ;;  %v372_v8 = vand.u32 4294901760, %v2593_v3  ;;  %v84_v11 = vsel %vm52_vm0, %v31_v54, 0  ;;  %v34_v54 = vld [vmem:[%s3060_s0 + $0x68] sm:$0xff] }
  0x18   :  { %1951 = vmatprep.mubr.f32.mxu0 %v196_v57  ;;  %2119 = vmatpush3.bf16.msra.mxu0 %v2486_v47  ;;  %v237_v44 = vsub.f32 %v2574_v48, %v236_v4  ;;  %v247_v62 = vsub.f32 %v2577_v52, %v246_v2  ;;  %v256_v20 = vand.u32 4294901760, %v2600_v6  ;;  %v2614_v63 = vsub.f32 %v81_v60, %v2602_v19 }
  0x19   :  { %2073 = vmatprep.subr.bf16.mxu1 %v2072_v7  ;;  %2121 = vmatprep.subr.bf16.mxu0 %v2120_v43  ;;  %v366_v57 = vsub.f32 %v2588_v61, %v365_v10  ;;  %v373_v47 = vsub.f32 %v2593_v3, %v372_v8  ;;  %v2124_v9 = vpack.c.bf16 %v372_v8, %v365_v10  ;;  %v2621_v26 = vand.u32 4294901760, %v84_v11 }
  0x1a   :  { %1832 = vmatmul.mubr.f32.gmra.mrb[2].mxu1 %v208_v21  ;;  %1952 = vmatmul.mubr.f32.gmra.mrb[2].mxu0 %v206_v58  ;;  %v238_v37 = vand.u32 4294901760, %v237_v44  ;;  %v248_v40 = vand.u32 4294901760, %v247_v62  ;;  %v257_v45 = vsub.f32 %v2600_v6, %v256_v20  ;;  %v266_v46 = vand.u32 4294901760, %v2614_v63 }
  0x1b   :  { %1834 = vmatprep.mubr.f32.mxu1 %v218_v31  ;;  %1954 = vmatprep.mubr.f32.mxu0 %v216_v0  ;;  %v367_v21 = vand.u32 4294901760, %v366_v57  ;;  %v374_v56 = vand.u32 4294901760, %v373_v47  ;;  %v2638_v58 = vsub.f32 %v84_v11, %v2621_v26  ;;  %v87_v60 = vsel %vm52_vm0, %v32_v5, 0  ;;  %v35_v0 = vld [vmem:[%s3060_s0 + $0x70] sm:$0xff] }
  0x1c   :  { %2075 = vmatpush3.bf16.msra.mxu1 %v2072_v7  ;;  %2123 = vmatpush3.bf16.msra.mxu0 %v2120_v43  ;;  %v258_v10 = vand.u32 4294901760, %v257_v45  ;;  %v267_v8 = vsub.f32 %v2614_v63, %v266_v46  ;;  %v2642_v44 = vand.u32 4294901760, %v87_v60  ;;  %v90_v62 = vsel %vm52_vm0, %v33_v33, 0  ;;  %v36_v45 = vld [vmem:[%s3060_s0 + $0x78] sm:$0xff] }
  0x1d   :  { %v2076_v31 = vpack.c.bf16 %v374_v56, %v367_v21  ;;  %2125 = vmatprep.subr.bf16.mxu0 %v2124_v9  ;;  %v276_v11 = vand.u32 4294901760, %v2638_v58  ;;  %v2649_v57 = vand.u32 4294901760, %v90_v62  ;;  %v93_v7 = vsel %vm52_vm0, %v34_v54, 0 }
  0x1e   :  { %1835 = vmatmul.mubr.f32.gmra.mrb[4].mxu1 %v228_v38  ;;  %1955 = vmatmul.mubr.f32.gmra.mrb[4].mxu0 %v226_v14  ;;  %v268_v43 = vand.u32 4294901760, %v267_v8  ;;  %v2657_v5 = vsub.f32 %v87_v60, %v2642_v44  ;;  %v2659_v47 = vand.u32 4294901760, %v93_v7  ;;  %v2664_v33 = vsub.f32 %v2401_v12, %v120_v16 }
  0x1f   :  { %1837 = vmatprep.mubr.f32.mxu1 %v238_v37  ;;  %1957 = vmatprep.mubr.f32.mxu0 %v236_v4  ;;  %v277_v25 = vsub.f32 %v2638_v58, %v276_v11  ;;  %v2671_v14 = vsub.f32 %v90_v62, %v2649_v57  ;;  %v2676_v38 = vsub.f32 %v2406_v13, %v123_v17  ;;  %v96_v54 = vsel %vm52_vm0, %v35_v0, 0 }
  0x20   :  { %3068 = vst [vmem:[#allocation5_spill] sm:$0xff] %v2657_v5  ;;  %2077 = vmatprep.subr.bf16.mxu1 %v2076_v31  ;;  %2127 = vmatpush3.bf16.msra.mxu0 %v2124_v9  ;;  %v286_v12 = vand.u32 4294901760, %v2657_v5  ;;  %v2681_v16 = vsub.f32 %v93_v7, %v2659_v47  ;;  %v379_v4 = vand.u32 4294901760, %v2664_v33  ;;  %v2684_v37 = vand.u32 4294901760, %v96_v54 }
  0x21   :  { %3069 = vst [vmem:[#allocation6_spill] sm:$0xff] %v2671_v14  ;;  %2079 = vmatpush3.bf16.msra.mxu1 %v2076_v31  ;;  %v278_v21 = vand.u32 4294901760, %v277_v25  ;;  %v296_v56 = vand.u32 4294901760, %v2671_v14  ;;  %v386_v13 = vand.u32 4294901760, %v2676_v38  ;;  %v99_v17 = vsel %vm52_vm0, %v36_v45, 0 }
  0x22   :  { %1838 = vmatmul.mubr.f32.gmra.mrb[6].mxu1 %v248_v40  ;;  %1958 = vmatmul.mubr.f32.gmra.mrb[6].mxu0 %v246_v2  ;;  %v287_v9 = vsub.f32 %v2657_v5, %v286_v12  ;;  %v306_v60 = vand.u32 4294901760, %v2681_v16  ;;  %v380_v8 = vsub.f32 %v2664_v33, %v379_v4  ;;  %v2695_v62 = vsub.f32 %v96_v54, %v2684_v37 }
  0x23   :  { %1840 = vmatprep.mubr.f32.mxu1 %v258_v10  ;;  %1960 = vmatprep.mubr.f32.mxu0 %v256_v20  ;;  %v297_v0 = vsub.f32 %v2671_v14, %v296_v56  ;;  %v387_v40 = vsub.f32 %v2676_v38, %v386_v13  ;;  %v2128_v31 = vpack.c.bf16 %v386_v13, %v379_v4  ;;  %v2701_v7 = vand.u32 4294901760, %v99_v17 }
  0x24   :  { %v381_v2 = vand.u32 4294901760, %v380_v8  ;;  %v316_v45 = vand.u32 4294901760, %v2695_v62  ;;  %v288_v10 = vand.u32 4294901760, %v287_v9  ;;  %v307_v20 = vsub.f32 %v2681_v16, %v306_v60 }
  0x25   :  { %v388_v25 = vand.u32 4294901760, %v387_v40  ;;  %2129 = vmatprep.subr.bf16.mxu0 %v2128_v31  ;;  %v2705_v5 = vsub.f32 %v99_v17, %v2701_v7  ;;  %v298_v54 = vand.u32 4294901760, %v297_v0  ;;  %v2084_v8 = vpack.c.bf16 %v2455_v30, %v2453_v29 }
  0x26   :  { %1841 = vmatmul.mubr.f32.gmra.mrb[8].mxu1 %v268_v43  ;;  %1961 = vmatmul.mubr.f32.gmra.mrb[8].mxu0 %v266_v46  ;;  %v317_v4 = vsub.f32 %v2695_v62, %v316_v45  ;;  %v308_v46 = vand.u32 4294901760, %v307_v20  ;;  %v2088_v29 = vpack.c.bf16 %v2536_v18, %v2522_v1  ;;  %v2092_v30 = vpack.c.bf16 %v2593_v3, %v2588_v61 }
  0x27   :  { %1843 = vmatprep.mubr.f32.mxu1 %v278_v21  ;;  %1963 = vmatprep.mubr.f32.mxu0 %v276_v11  ;;  %v2080_v14 = vpack.c.bf16 %v388_v25, %v381_v2  ;;  %v326_v13 = vand.u32 4294901760, %v2705_v5 }
  0x28   :  { %2131 = vmatpush3.bf16.msra.mxu0 %v2128_v31  ;;  %v318_v11 = vand.u32 4294901760, %v317_v4 }
  0x29   :  { %2081 = vmatprep.subr.bf16.mxu1 %v2080_v14  ;;  %2133 = vmatprep.subr.bf16.mxu0 %v2411_v15  ;;  %v327_v43 = vsub.f32 %v2705_v5, %v326_v13 }
  0x2a   :  { %1844 = vmatmul.mubr.f32.gmra.mrb[10].mxu1 %v288_v10  ;;  %1964 = vmatmul.mubr.f32.gmra.mrb[10].mxu0 %v286_v12 }
  0x2b   :  { %1846 = vmatprep.mubr.f32.mxu1 %v298_v54  ;;  %1966 = vmatprep.mubr.f32.mxu0 %v296_v56  ;;  %v328_v21 = vand.u32 4294901760, %v327_v43 }
  0x2c   :  { %2083 = vmatpush3.bf16.msra.mxu1 %v2080_v14 }
  0x2d   :  { %2085 = vmatprep.subr.bf16.mxu1 %v2084_v8 }
  0x2e   :  { %1847 = vmatmul.mubr.f32.gmra.mrb[12].mxu1 %v308_v46  ;;  %1967 = vmatmul.mubr.f32.gmra.mrb[12].mxu0 %v306_v60 }
  0x2f   :  { %1849 = vmatprep.mubr.f32.mxu1 %v318_v11  ;;  %1969 = vmatprep.mubr.f32.mxu0 %v316_v45 }
  0x32   :  { %1850 = vmatmul.mubr.f32.gmra.mrb[14].mxu1 %v328_v21  ;;  %1970 = vmatmul.mubr.f32.gmra.mrb[14].mxu0 %v326_v13 }
  0x33   :  { %1868 = vmatprep.mubr.f32.mxu1 %v2437_v24  ;;  %1988 = vmatprep.mubr.f32.mxu0 %v2437_v24 }
  0x36   :  { %1869 = vmatmul.mubr.f32.vlgmr.msra.gmra.mrb[0].mxu1 %v2451_v28  ;;  %1989 = vmatmul.mubr.f32.vlgmr.msra.gmra.mrb[0].mxu0 %v2451_v28 }
  0x37   :  { %2087 = vmatpush3.bf16.msra.mxu1 %v2084_v8  ;;  %1871 = vmatprep.mubr.f32.mxu1 %v2475_v39 }
  0x38   :  { %1991 = vmatprep.mubr.f32.mxu0 %v2475_v39  ;;  %2135 = vmatpush3.bf16.msra.mxu0 %v2411_v15  ;;  %v2096_v15 = vpack.c.bf16 %v2676_v38, %v2664_v33 }
  0x39   :  { %2089 = vmatprep.subr.bf16.mxu1 %v2088_v29  ;;  %2137 = vmatprep.subr.bf16.mxu0 %v2429_v22 }
  0x3a   :  { %1872 = vmatmul.mubr.f32.gmra.mrb[2].mxu1 %v2478_v41  ;;  %1992 = vmatmul.mubr.f32.gmra.mrb[2].mxu0 %v2478_v41 }
  0x3b   :  { %1874 = vmatprep.mubr.f32.mxu1 %v2480_v42  ;;  %1994 = vmatprep.mubr.f32.mxu0 %v2480_v42 }
  0x3c   :  { %2091 = vmatpush3.bf16.msra.mxu1 %v2088_v29  ;;  %2139 = vmatpush3.bf16.msra.mxu0 %v2429_v22  ;;  %v3070_v22 = vld [vmem:[#allocation5_spill] sm:$0xff] }
  0x3d   :  { %2093 = vmatprep.subr.bf16.mxu1 %v2092_v30  ;;  %2141 = vmatprep.subr.bf16.mxu0 %v2435_v23 }
  0x3e   :  { %1875 = vmatmul.mubr.f32.gmra.mrb[4].mxu1 %v2497_v51  ;;  %1995 = vmatmul.mubr.f32.gmra.mrb[4].mxu0 %v2497_v51 }
  0x3f   :  { %1877 = vmatprep.mubr.f32.mxu1 %v2560_v34  ;;  %1997 = vmatprep.mubr.f32.mxu0 %v2560_v34 }
  0x40   :  { %2095 = vmatpush3.bf16.msra.mxu1 %v2092_v30  ;;  %2143 = vmatpush3.bf16.msra.mxu0 %v2435_v23  ;;  %v3071_v23 = vld [vmem:[#allocation6_spill] sm:$0xff] }
  0x41   :  { %2097 = vmatprep.subr.bf16.mxu1 %v2096_v15  ;;  %2145 = vmatprep.subr.bf16.mxu0 %v2449_v27 }
  0x42   :  { %1878 = vmatmul.mubr.f32.gmra.mrb[6].mxu1 %v2562_v35  ;;  %1998 = vmatmul.mubr.f32.gmra.mrb[6].mxu0 %v2562_v35 }
  0x43   :  { %1880 = vmatprep.mubr.f32.mxu1 %v2579_v53  ;;  %2000 = vmatprep.mubr.f32.mxu0 %v2579_v53 }
  0x44   :  { %2099 = vmatpush3.bf16.msra.mxu1 %v2096_v15  ;;  %2147 = vmatpush3.bf16.msra.mxu0 %v2449_v27 }
  0x46   :  { %1881 = vmatmul.mubr.f32.gmra.mrb[8].mxu1 %v2602_v19  ;;  %2001 = vmatmul.mubr.f32.gmra.mrb[8].mxu0 %v2602_v19 }
  0x47   :  { %1883 = vmatprep.mubr.f32.mxu1 %v2621_v26  ;;  %2003 = vmatprep.mubr.f32.mxu0 %v2621_v26 }
  0x4a   :  { %1884 = vmatmul.mubr.f32.gmra.mrb[10].mxu1 %v2642_v44  ;;  %2004 = vmatmul.mubr.f32.gmra.mrb[10].mxu0 %v2642_v44 }
  0x4b   :  { %1886 = vmatprep.mubr.f32.mxu1 %v2649_v57  ;;  %2006 = vmatprep.mubr.f32.mxu0 %v2649_v57 }
  0x4e   :  { %1887 = vmatmul.mubr.f32.gmra.mrb[12].mxu1 %v2659_v47  ;;  %2007 = vmatmul.mubr.f32.gmra.mrb[12].mxu0 %v2659_v47 }
  0x4f   :  { %1889 = vmatprep.mubr.f32.mxu1 %v2684_v37  ;;  %2009 = vmatprep.mubr.f32.mxu0 %v2684_v37 }
  0x52   :  { %1890 = vmatmul.mubr.f32.gmra.mrb[14].mxu1 %v2701_v7  ;;  %2010 = vmatmul.mubr.f32.gmra.mrb[14].mxu0 %v2701_v7 }
  0x53   :  { %1908 = vmatprep.mubr.f32.mxu1 %v2463_v32  ;;  %2028 = vmatprep.mubr.f32.mxu0 %v2437_v24  ;;  %v2794_v24 = vld [vmem:[%s3062_s2] ss:$0 sm:$0xff] }
  0x56   :  { %1909 = vmatmul.mubr.f32.vlgmr.msra.gmra.mrb[0].mxu1 %v2471_v36  ;;  %2029 = vmatmul.mubr.f32.vlgmr.msra.gmra.mrb[0].mxu0 %v2451_v28 }
  0x57   :  { %1911 = vmatprep.mubr.f32.mxu1 %v2492_v49  ;;  %2031 = vmatprep.mubr.f32.mxu0 %v2475_v39 }
  0x5a   :  { %1912 = vmatmul.mubr.f32.gmra.mrb[2].mxu1 %v2495_v50  ;;  %2032 = vmatmul.mubr.f32.gmra.mrb[2].mxu0 %v2478_v41 }
  0x5b   :  { %1914 = vmatprep.mubr.f32.mxu1 %v2505_v55  ;;  %2034 = vmatprep.mubr.f32.mxu0 %v2480_v42 }
  0x5e   :  { %1915 = vmatmul.mubr.f32.gmra.mrb[4].mxu1 %v2510_v59  ;;  %2035 = vmatmul.mubr.f32.gmra.mrb[4].mxu0 %v2497_v51 }
  0x5f   :  { %1917 = vmatprep.mubr.f32.mxu1 %v2574_v48  ;;  %2037 = vmatprep.mubr.f32.mxu0 %v2560_v34 }
  0x62   :  { %1918 = vmatmul.mubr.f32.gmra.mrb[6].mxu1 %v2577_v52  ;;  %2038 = vmatmul.mubr.f32.gmra.mrb[6].mxu0 %v2562_v35 }
  0x63   :  { %1920 = vmatprep.mubr.f32.mxu1 %v2600_v6  ;;  %2040 = vmatprep.mubr.f32.mxu0 %v2579_v53 }
  0x66   :  { %1921 = vmatmul.mubr.f32.gmra.mrb[8].mxu1 %v2614_v63  ;;  %2041 = vmatmul.mubr.f32.gmra.mrb[8].mxu0 %v2602_v19 }
  0x67   :  { %1923 = vmatprep.mubr.f32.mxu1 %v2638_v58  ;;  %2043 = vmatprep.mubr.f32.mxu0 %v2621_v26 }
  0x6a   :  { %1924 = vmatmul.mubr.f32.gmra.mrb[10].mxu1 %v3070_v22  ;;  %2044 = vmatmul.mubr.f32.gmra.mrb[10].mxu0 %v2642_v44 }
  0x6b   :  { %1926 = vmatprep.mubr.f32.mxu1 %v3071_v23  ;;  %2046 = vmatprep.mubr.f32.mxu0 %v2649_v57 }
  0x6e   :  { %1927 = vmatmul.mubr.f32.gmra.mrb[12].mxu1 %v2681_v16  ;;  %2047 = vmatmul.mubr.f32.gmra.mrb[12].mxu0 %v2659_v47 }
  0x6f   :  { %1929 = vmatprep.mubr.f32.mxu1 %v2695_v62  ;;  %2049 = vmatprep.mubr.f32.mxu0 %v2684_v37 }
  0x72   :  { %1930 = vmatmul.mubr.f32.gmra.mrb[14].mxu1 %v2705_v5  ;;  %2050 = vmatmul.mubr.f32.gmra.mrb[14].mxu0 %v2701_v7 }
 0x129   :  { %v1910_v27 = vpop.f32.mrb[0].mxu1  ;;  %v2030_v28 = vpop.f32.mrb[0].mxu0 }
 0x12a   :  { %v2148_v32 = vadd.f32 %v1910_v27, %v2794_v24  ;;  %v619_v36 = vpop.f32.mrb[1].mxu1  ;;  %v1189_v39 = vpop.f32.mrb[1].mxu0 }
 0x12b   :  { %v2150_v41 = vadd.f32 %v2794_v24, %v619_v36 }
 0x12c   :  { %v2798_v42 = vadd.f32 %v2148_v32, %v2030_v28 }
 0x12d   :  { %v2800_v49 = vadd.f32 %v2150_v41, %v1189_v39  ;;  %v1913_v50 = vpop.f32.mrb[2].mxu1  ;;  %v2033_v51 = vpop.f32.mrb[2].mxu0 }
 0x12e   :  { %v2152_v55 = vadd.f32 %v1913_v50, %v2794_v24  ;;  %v1201_v59 = vpop.f32.mrb[3].mxu0  ;;  %1285 = vadd.xlane.f32.xlu0 %v2798_v42  ;;  %v633_v1 = vpop.f32.mrb[3].mxu1  ;;  %v1316_v18 = vmul.f32 %v2798_v42, %v2798_v42 }
 0x12f   :  { %v2154_v34 = vadd.f32 %v2794_v24, %v633_v1  ;;  %v1315_v26 = vmul.f32 %v2800_v49, %v2800_v49 }
 0x130   :  { %v2807_v35 = vadd.f32 %v2152_v55, %v2033_v51  ;;  %1333 = vadd.xlane.f32.xlu1 %v1316_v18 }
 0x131   :  { %v2809_v48 = vadd.f32 %v2154_v34, %v1201_v59  ;;  %v1916_v52 = vpop.f32.mrb[4].mxu1  ;;  %v2036_v53 = vpop.f32.mrb[4].mxu0 }
 0x132   :  { %v2156_v61 = vadd.f32 %v1916_v52, %v2794_v24  ;;  %v1213_v3 = vpop.f32.mrb[5].mxu0  ;;  %1283 = vadd.xlane.f32.xlu0 %v2800_v49  ;;  %v647_v6 = vpop.f32.mrb[5].mxu1  ;;  %v1318_v62 = vmul.f32 %v2807_v35, %v2807_v35 }
 0x133   :  { %v2158_v19 = vadd.f32 %v2794_v24, %v647_v6  ;;  %v1317_v12 = vmul.f32 %v2809_v48, %v2809_v48 }
 0x134   :  { %v2814_v63 = vadd.f32 %v2156_v61, %v2036_v53  ;;  %1289 = vadd.xlane.f32.xlu1 %v2807_v35 }
 0x135   :  { %v2819_v58 = vadd.f32 %v2158_v19, %v1213_v3  ;;  %v1919_v44 = vpop.f32.mrb[6].mxu1  ;;  %v2039_v57 = vpop.f32.mrb[6].mxu0 }
 0x136   :  { %v2160_v5 = vadd.f32 %v1919_v44, %v2794_v24  ;;  %v1225_v47 = vpop.f32.mrb[7].mxu0  ;;  %1331 = vadd.xlane.f32.xlu0 %v1315_v26  ;;  %v661_v33 = vpop.f32.mrb[7].mxu1  ;;  %v1320_v29 = vmul.f32 %v2814_v63, %v2814_v63 }
 0x137   :  { %v2162_v14 = vadd.f32 %v2794_v24, %v661_v33  ;;  %v1319_v4 = vmul.f32 %v2819_v58, %v2819_v58 }
 0x138   :  { %v2823_v38 = vadd.f32 %v2160_v5, %v2039_v57  ;;  %1287 = vadd.xlane.f32.xlu1 %v2809_v48 }
 0x139   :  { %v2828_v16 = vadd.f32 %v2162_v14, %v1225_v47  ;;  %v1922_v37 = vpop.f32.mrb[8].mxu1  ;;  %v2042_v56 = vpop.f32.mrb[8].mxu0 }
 0x13a   :  { %v2164_v17 = vadd.f32 %v1922_v37, %v2794_v24  ;;  %v1237_v9 = vpop.f32.mrb[9].mxu0  ;;  %1335 = vadd.xlane.f32.xlu0 %v1317_v12  ;;  %v675_v60 = vpop.f32.mrb[9].mxu1  ;;  %v1322_v55 = vmul.f32 %v2823_v38, %v2823_v38 }
 0x13b   :  { %v2166_v0 = vadd.f32 %v2794_v24, %v675_v60  ;;  %v1321_v50 = vmul.f32 %v2828_v16, %v2828_v16 }
 0x13c   :  { %v2834_v40 = vadd.f32 %v2164_v17, %v2042_v56  ;;  %1337 = vadd.xlane.f32.xlu1 %v1318_v62 }
 0x13d   :  { %v2836_v31 = vadd.f32 %v2166_v0, %v1237_v9  ;;  %v1925_v7 = vpop.f32.mrb[10].mxu1  ;;  %v2045_v2 = vpop.f32.mrb[10].mxu0 }
 0x13e   :  { %v2168_v45 = vadd.f32 %v1925_v7, %v2794_v24  ;;  %v1249_v25 = vpop.f32.mrb[11].mxu0  ;;  %1291 = vadd.xlane.f32.xlu0 %v2819_v58  ;;  %v689_v10 = vpop.f32.mrb[11].mxu1  ;;  %v1324_v59 = vmul.f32 %v2834_v40, %v2834_v40 }
 0x13f   :  { %v2170_v20 = vadd.f32 %v2794_v24, %v689_v10 }
 0x140   :  { %v2841_v54 = vadd.f32 %v2168_v45, %v2045_v2  ;;  %1293 = vadd.xlane.f32.xlu1 %v2814_v63 }
 0x141   :  { %v2846_v13 = vadd.f32 %v2170_v20, %v1249_v25  ;;  %v1928_v8 = vpop.f32.mrb[12].mxu1  ;;  %v2048_v46 = vpop.f32.mrb[12].mxu0 }
 0x142   :  { %v2172_v43 = vadd.f32 %v1928_v8, %v2794_v24  ;;  %v1261_v11 = vpop.f32.mrb[13].mxu0  ;;  %1339 = vadd.xlane.f32.xlu0 %v1319_v4  ;;  %v703_v21 = vpop.f32.mrb[13].mxu1  ;;  %v1326_v18 = vmul.f32 %v2841_v54, %v2841_v54 }
 0x143   :  { %v2174_v30 = vadd.f32 %v2794_v24, %v703_v21  ;;  %v1325_v1 = vmul.f32 %v2846_v13, %v2846_v13 }
 0x144   :  { %v2852_v15 = vadd.f32 %v2172_v43, %v2048_v46  ;;  %1341 = vadd.xlane.f32.xlu1 %v1320_v29 }
 0x145   :  { %v2854_v22 = vadd.f32 %v2174_v30, %v1261_v11  ;;  %v1931_v23 = vpop.f32.mrb[14].mxu1  ;;  %v2051_v27 = vpop.f32.mrb[14].mxu0 }
 0x146   :  { %v2176_v28 = vadd.f32 %v1931_v23, %v2794_v24  ;;  %v1273_v32 = vpop.f32.mrb[15].mxu0  ;;  %1295 = vadd.xlane.f32.xlu0 %v2828_v16  ;;  %v717_v36 = vpop.f32.mrb[15].mxu1  ;;  %v1328_v52 = vmul.f32 %v2852_v15, %v2852_v15 }
 0x147   :  { %v2178_v39 = vadd.f32 %v2794_v24, %v717_v36  ;;  %v1323_v24 = vmul.f32 %v2836_v31, %v2836_v31  ;;  %v1327_v34 = vmul.f32 %v2854_v22, %v2854_v22 }
 0x148   :  { %v2859_v41 = vadd.f32 %v2176_v28, %v2051_v27  ;;  %1297 = vadd.xlane.f32.xlu1 %v2823_v38 }
 0x149   :  { %v2864_v51 = vadd.f32 %v2178_v39, %v1273_v32 }
 0x14a   :  { %1343 = vadd.xlane.f32.xlu0 %v1321_v50  ;;  %v1330_v61 = vmul.f32 %v2859_v41, %v2859_v41  ;;  %v2908_v50 = vld [vmem:[%s3063_s3] ss:$0 sm:$0xff]  ;;  %s2335_s3 = smov [#allocation2]  }
 0x14b   :  { %v1329_v53 = vmul.f32 %v2864_v51, %v2864_v51 }
 0x14c   :  { %1345 = vadd.xlane.f32.xlu1 %v1322_v55 }
 0x14e   :  { %1299 = vadd.xlane.f32.xlu0 %v2836_v31 }
 0x150   :  { %1301 = vadd.xlane.f32.xlu1 %v2834_v40 }
 0x152   :  { %1347 = vadd.xlane.f32.xlu0 %v1323_v24 }
 0x154   :  { %1349 = vadd.xlane.f32.xlu1 %v1324_v59 }
 0x156   :  { %1303 = vadd.xlane.f32.xlu0 %v2846_v13 }
 0x158   :  { %1305 = vadd.xlane.f32.xlu1 %v2841_v54 }
 0x15a   :  { %1351 = vadd.xlane.f32.xlu0 %v1325_v1 }
 0x15c   :  { %1353 = vadd.xlane.f32.xlu1 %v1326_v18 }
 0x15e   :  { %1307 = vadd.xlane.f32.xlu0 %v2854_v22 }
 0x160   :  { %1309 = vadd.xlane.f32.xlu1 %v2852_v15 }
 0x162   :  { %1355 = vadd.xlane.f32.xlu0 %v1327_v34 }
 0x164   :  { %1357 = vadd.xlane.f32.xlu1 %v1328_v52 }
 0x166   :  { %1311 = vadd.xlane.f32.xlu0 %v2864_v51 }
 0x168   :  { %1313 = vadd.xlane.f32.xlu1 %v2859_v41 }
 0x16a   :  { %1359 = vadd.xlane.f32.xlu0 %v1329_v53 }
 0x16c   :  { %1361 = vadd.xlane.f32.xlu1 %v1330_v61 }
 0x1bb   :  { %v1286_v3 = vpop.xlane.xlu0 %1285 }
 0x1bc   :  { %v1364_v6 = vmul.f32 0.0078125, %v1286_v3 }
 0x1bd   :  { %v1334_v19 = vpop.xlane.xlu1 %1333 }
 0x1be   :  { %v1396_v26 = vmul.f32 %v1364_v6, %v1364_v6  ;;  %v1380_v44 = vmul.f32 0.0078125, %v1334_v19  ;;  %v1444_v28 = vsub.f32 %v2798_v42, %v1364_v6  ;;  %v2915_v42 = vld [vmem:[%s3064_s4] ss:$0 sm:$0xff]  ;;  %s1654_s4 = sshll.u32 %s2335_s3, 4  ;;  %s1655_s4 = int_to_ptr.vmem [resolvable:$true] %s1654_s4 }
 0x1bf   :  { %v1284_v57 = vpop.xlane.xlu0 %1283  ;;  %s2311_s18 = scalar_lea.vmem %s1655_s4, 2048  ;;  %p2316_p1 = scmp.lt.s32.totalorder %s1655_s4, %s1655_s4 }
 0x1c0   :  { %v1412_v5 = vsub.f32 %v1380_v44, %v1396_v26  ;;  %v1363_v47 = vmul.f32 0.0078125, %v1284_v57  ;;  %p2312_p0 = scmp.ne.s32.totalorder %s1655_s4, %s2311_s18  ;;  %p2317_p2 = scmp.lt.s32.totalorder %s2311_s18, %s2311_s18 }
 0x1c1   :  { %v1290_v33 = vpop.xlane.xlu1 %1289 }
 0x1c2   :  { %v1428_v14 = vmax.f32 %v1412_v5, 0.0  ;;  %v1395_v56 = vmul.f32 %v1363_v47, %v1363_v47  ;;  %v2892_v60 = vmul.f32 0.0078125, %v1290_v33  ;;  %v1443_v57 = vsub.f32 %v2800_v49, %v1363_v47  ;;  %p2318_p3 = por %p2317_p2, %p2316_p1 }
 0x1c3   :  { %v1332_v12 = vpop.xlane.xlu0 %1331 }
 0x1c4   :  { %v1460_v37 = vadd.f32 1e-05, %v1428_v14  ;;  %v1379_v17 = vmul.f32 0.0078125, %v1332_v12  ;;  %v1398_v20 = vmul.f32 %v2892_v60, %v2892_v60  ;;  %p2319_p4 = pnand %p2318_p3, %p2312_p0 }
 0x1c5   :  { %v1288_v9 = vpop.xlane.xlu1 %1287 }
 0x1c6   :  { %2247 = vrsqrt.f32 %v1460_v37  ;;  %v1411_v62 = vsub.f32 %v1379_v17, %v1395_v56  ;;  %v2894_v0 = vmul.f32 0.0078125, %v1288_v9 }
 0x1c7   :  { %v1336_v7 = vpop.xlane.xlu0 %1335 }
 0x1c8   :  { %v1427_v2 = vmax.f32 %v1411_v62, 0.0  ;;  %v1397_v45 = vmul.f32 %v2894_v0, %v2894_v0  ;;  %v1381_v25 = vmul.f32 0.0078125, %v1336_v7  ;;  %v1445_v49 = vsub.f32 %v2809_v48, %v2894_v0 }
 0x1c9   :  { %v1338_v10 = vpop.xlane.xlu1 %1337 }
 0x1ca   :  { %v1459_v4 = vadd.f32 1e-05, %v1427_v2  ;;  %v1413_v8 = vsub.f32 %v1381_v25, %v1397_v45  ;;  %v1382_v46 = vmul.f32 0.0078125, %v1338_v10 }
 0x1cb   :  { %v1292_v43 = vpop.xlane.xlu0 %1291 }
 0x1cc   :  { %2249 = vrsqrt.f32 %v1459_v4  ;;  %v1429_v11 = vmax.f32 %v1413_v8, 0.0  ;;  %v1414_v21 = vsub.f32 %v1382_v46, %v1398_v20  ;;  %v2900_v29 = vmul.f32 0.0078125, %v1292_v43 }
 0x1cd   :  { %v1294_v30 = vpop.xlane.xlu1 %1293  ;;  %v1446_v8 = vsub.f32 %v2807_v35, %v2892_v60 }
 0x1ce   :  { %v1461_v23 = vadd.f32 1e-05, %v1429_v11  ;;  %v1430_v27 = vmax.f32 %v1414_v21, 0.0  ;;  %v2903_v32 = vmul.f32 0.0078125, %v1294_v30  ;;  %v1399_v24 = vmul.f32 %v2900_v29, %v2900_v29 }
 0x1cf   :  { %v1340_v36 = vpop.xlane.xlu0 %1339 }
 0x1d0   :  { %v2248_v39 = vpop.eup %2247  ;;  %2251 = vrsqrt.f32 %v1461_v23  ;;  %v1462_v55 = vadd.f32 1e-05, %v1430_v27  ;;  %v1383_v59 = vmul.f32 0.0078125, %v1340_v36  ;;  %v1400_v34 = vmul.f32 %v2903_v32, %v2903_v32 }
 0x1d1   :  { %v1492_v1 = vmul.f32 %v2248_v39, %v1444_v28  ;;  %v1342_v18 = vpop.xlane.xlu1 %1341 }
 0x1d2   :  { %2253 = vrsqrt.f32 %v1462_v55  ;;  %v1415_v52 = vsub.f32 %v1383_v59, %v1399_v24  ;;  %v1384_v53 = vmul.f32 0.0078125, %v1342_v18 }
 0x1d3   :  { %v1515_v61 = vmul.f32 %v2908_v50, %v1492_v1  ;;  %v1296_v3 = vpop.xlane.xlu0 %1295 }
 0x1d4   :  { %v1431_v6 = vmax.f32 %v1415_v52, 0.0  ;;  %v1416_v19 = vsub.f32 %v1384_v53, %v1400_v34  ;;  %v2920_v26 = vmul.f32 0.0078125, %v1296_v3  ;;  %v1448_v3 = vsub.f32 %v2814_v63, %v2903_v32 }
 0x1d5   :  { %v1538_v44 = vadd.f32 %v2915_v42, %v1515_v61  ;;  %v1298_v5 = vpop.xlane.xlu1 %1297  ;;  %v1447_v61 = vsub.f32 %v2819_v58, %v2900_v29 }
 0x1d6   :  { %v2250_v33 = vpop.eup %2249  ;;  %v1463_v14 = vadd.f32 1e-05, %v1431_v6  ;;  %v1432_v12 = vmax.f32 %v1416_v19, 0.0  ;;  %v2924_v17 = vmul.f32 0.0078125, %v1298_v5  ;;  %v1401_v7 = vmul.f32 %v2920_v26, %v2920_v26 }
 0x1d7   :  { %v1570_v37 = vmul.f32 0.70710677, %v1538_v44  ;;  %v1491_v56 = vmul.f32 %v2250_v33, %v1443_v57  ;;  %v1344_v9 = vpop.xlane.xlu0 %1343 }
 0x1d8   :  { %2255 = vrsqrt.f32 %v1463_v14  ;;  %v1464_v62 = vadd.f32 1e-05, %v1432_v12  ;;  %v1385_v2 = vmul.f32 0.0078125, %v1344_v9  ;;  %v1402_v10 = vmul.f32 %v2924_v17, %v2924_v17 }
 0x1d9   :  { %2257 = verf.f32 %v1570_v37  ;;  %v1514_v45 = vmul.f32 %v2908_v50, %v1491_v56  ;;  %v1346_v47 = vpop.xlane.xlu1 %1345  ;;  %v1554_v12 = vmul.f32 0.5, %v1538_v44 }
 0x1da   :  { %v2252_v25 = vpop.eup %2251  ;;  %2259 = vrsqrt.f32 %v1464_v62  ;;  %v1417_v20 = vsub.f32 %v1385_v2, %v1401_v7  ;;  %v1386_v4 = vmul.f32 0.0078125, %v1346_v47 }
 0x1db   :  { %v2936_v46 = vadd.f32 %v2915_v42, %v1514_v45  ;;  %v1493_v43 = vmul.f32 %v2252_v25, %v1445_v49  ;;  %v1300_v11 = vpop.xlane.xlu0 %1299 }
 0x1dc   :  { %v2254_v21 = vpop.eup %2253  ;;  %v1433_v30 = vmax.f32 %v1417_v20, 0.0  ;;  %v1418_v23 = vsub.f32 %v1386_v4, %v1402_v10  ;;  %v2938_v48 = vmul.f32 0.0078125, %v1300_v11 }
 0x1dd   :  { %v1569_v0 = vmul.f32 0.70710677, %v2936_v46  ;;  %v1516_v27 = vmul.f32 %v2908_v50, %v1493_v43  ;;  %v1494_v28 = vmul.f32 %v2254_v21, %v1446_v8  ;;  %v1302_v36 = vpop.xlane.xlu1 %1301 }
 0x1de   :  { %v1465_v39 = vadd.f32 1e-05, %v1433_v30  ;;  %v1434_v55 = vmax.f32 %v1418_v23, 0.0  ;;  %v2946_v24 = vmul.f32 0.0078125, %v1302_v36  ;;  %v1403_v18 = vmul.f32 %v2938_v48, %v2938_v48 }
 0x1df   :  { %2261 = verf.f32 %v1569_v0  ;;  %v2943_v35 = vadd.f32 %v2915_v42, %v1516_v27  ;;  %v1517_v60 = vmul.f32 %v2908_v50, %v1494_v28  ;;  %v1348_v59 = vpop.xlane.xlu0 %1347  ;;  %v1449_v0 = vsub.f32 %v2828_v16, %v2920_v26 }
 0x1e0   :  { %2263 = vrsqrt.f32 %v1465_v39  ;;  %v1466_v1 = vadd.f32 1e-05, %v1434_v55  ;;  %v1387_v34 = vmul.f32 0.0078125, %v1348_v59  ;;  %v1404_v57 = vmul.f32 %v2946_v24, %v2946_v24 }
 0x1e1   :  { %v1571_v52 = vmul.f32 0.70710677, %v2943_v35  ;;  %v2952_v53 = vadd.f32 %v2915_v42, %v1517_v60  ;;  %v1350_v6 = vpop.xlane.xlu1 %1349  ;;  %v1553_v36 = vmul.f32 0.5, %v2936_v46  ;;  %v1450_v59 = vsub.f32 %v2823_v38, %v2924_v17 }
 0x1e2   :  { %v2256_v19 = vpop.eup %2255  ;;  %2265 = vrsqrt.f32 %v1466_v1  ;;  %v1419_v5 = vsub.f32 %v1387_v34, %v1403_v18  ;;  %v1388_v33 = vmul.f32 0.0078125, %v1350_v6  ;;  %v1555_v46 = vmul.f32 0.5, %v2943_v35 }
 0x1e3   :  { %v2258_v14 = vpop.eup %2257  ;;  %2267 = verf.f32 %v1571_v52  ;;  %v1572_v37 = vmul.f32 0.70710677, %v2952_v53  ;;  %v1495_v56 = vmul.f32 %v2256_v19, %v1447_v61  ;;  %v1304_v9 = vpop.xlane.xlu0 %1303 }
 0x1e4   :  { %v2260_v62 = vpop.eup %2259  ;;  %v1602_v58 = vadd.f32 1.0, %v2258_v14  ;;  %v1435_v29 = vmax.f32 %v1419_v5, 0.0  ;;  %v1420_v7 = vsub.f32 %v1388_v33, %v1404_v57  ;;  %v2961_v63 = vmul.f32 0.0078125, %v1304_v9 }
 0x1e5   :  { %2269 = verf.f32 %v1572_v37  ;;  %v1518_v32 = vmul.f32 %v2908_v50, %v1495_v56  ;;  %v1496_v2 = vmul.f32 %v2260_v62, %v1448_v3  ;;  %v1306_v45 = vpop.xlane.xlu1 %1305 }
 0x1e6   :  { %v1618_v49 = vmul.f32 %v1602_v58, %v1554_v12  ;;  %v1467_v47 = vadd.f32 1e-05, %v1435_v29  ;;  %v1436_v25 = vmax.f32 %v1420_v7, 0.0  ;;  %v1405_v20 = vmul.f32 %v2961_v63, %v2961_v63 }
 0x1e7   :  { %v2965_v44 = vadd.f32 %v2915_v42, %v1518_v32  ;;  %v1519_v10 = vmul.f32 %v2908_v50, %v1496_v2  ;;  %v1352_v4 = vpop.xlane.xlu0 %1351  ;;  %v2970_v43 = vmul.f32 0.0078125, %v1306_v45  ;;  %v1556_v12 = vmul.f32 0.5, %v2952_v53 }
 0x1e8   :  { %1634 = vst [vmem:[#allocation2 + $0x8] sm:$0xff] %v1618_v49  ;;  %2271 = vrsqrt.f32 %v1467_v47  ;;  %v1468_v8 = vadd.f32 1e-05, %v1436_v25  ;;  %v1389_v11 = vmul.f32 0.0078125, %v1352_v4  ;;  %v1451_v53 = vsub.f32 %v2836_v31, %v2938_v48 }
 0x1e9   :  { %v2262_v21 = vpop.eup %2261  ;;  %v1573_v30 = vmul.f32 0.70710677, %v2965_v44  ;;  %v2974_v23 = vadd.f32 %v2915_v42, %v1519_v10  ;;  %v1354_v27 = vpop.xlane.xlu1 %1353  ;;  %v1406_v16 = vmul.f32 %v2970_v43, %v2970_v43  ;;  %v1452_v4 = vsub.f32 %v2834_v40, %v2946_v24 }
 0x1ea   :  { %v2264_v28 = vpop.eup %2263  ;;  %v1601_v39 = vadd.f32 1.0, %v2262_v21  ;;  %2273 = vrsqrt.f32 %v1468_v8  ;;  %v1421_v55 = vsub.f32 %v1389_v11, %v1405_v20  ;;  %v1390_v61 = vmul.f32 0.0078125, %v1354_v27 }
 0x1eb   :  { %2275 = verf.f32 %v1573_v30  ;;  %v1574_v60 = vmul.f32 0.70710677, %v2974_v23  ;;  %v1497_v1 = vmul.f32 %v2264_v28, %v1449_v0  ;;  %v1308_v18 = vpop.xlane.xlu0 %1307  ;;  %v1557_v27 = vmul.f32 0.5, %v2965_v44 }
 0x1ec   :  { %v2266_v34 = vpop.eup %2265  ;;  %v1617_v52 = vmul.f32 %v1601_v39, %v1553_v36  ;;  %v1437_v26 = vmax.f32 %v1421_v55, 0.0  ;;  %v1422_v17 = vsub.f32 %v1390_v61, %v1406_v16  ;;  %v2986_v33 = vmul.f32 0.0078125, %v1308_v18 }
 0x1ed   :  { %v2268_v3 = vpop.eup %2267  ;;  %2277 = verf.f32 %v1574_v60  ;;  %v1520_v6 = vmul.f32 %v2908_v50, %v1497_v1  ;;  %v1498_v19 = vmul.f32 %v2266_v34, %v1450_v59  ;;  %v1310_v57 = vpop.xlane.xlu1 %1309  ;;  %v1558_v40 = vmul.f32 0.5, %v2974_v23 }
 0x1ee   :  { %1633 = vst [vmem:[#allocation2] sm:$0xff] %v1617_v52  ;;  %v1603_v5 = vadd.f32 1.0, %v2268_v3  ;;  %v1469_v38 = vadd.f32 1e-05, %v1437_v26  ;;  %v2993_v35 = vmul.f32 0.0078125, %v1310_v57  ;;  %v1438_v29 = vmax.f32 %v1422_v17, 0.0 }
 0x1ef   :  { %v2270_v14 = vpop.eup %2269  ;;  %v2990_v37 = vadd.f32 %v2915_v42, %v1520_v6  ;;  %v1521_v56 = vmul.f32 %v2908_v50, %v1498_v19  ;;  %v1356_v9 = vpop.xlane.xlu0 %1355  ;;  %v1407_v25 = vmul.f32 %v2986_v33, %v2986_v33  ;;  %v1453_v23 = vsub.f32 %v2846_v13, %v2961_v63 }
 0x1f0   :  { %v1619_v62 = vmul.f32 %v1603_v5, %v1555_v46  ;;  %v1604_v58 = vadd.f32 1.0, %v2270_v14  ;;  %2279 = vrsqrt.f32 %v1469_v38  ;;  %v1470_v47 = vadd.f32 1e-05, %v1438_v29 }
 0x1f1   :  { %v1575_v7 = vmul.f32 0.70710677, %v2990_v37  ;;  %v2997_v32 = vadd.f32 %v2915_v42, %v1521_v56  ;;  %v1358_v2 = vpop.xlane.xlu1 %1357  ;;  %v1391_v10 = vmul.f32 0.0078125, %v1356_v9  ;;  %v1408_v31 = vmul.f32 %v2993_v35, %v2993_v35 }
 0x1f2   :  { %v2272_v45 = vpop.eup %2271  ;;  %1635 = vst [vmem:[#allocation2 + $0x10] sm:$0xff] %v1619_v62  ;;  %v1620_v49 = vmul.f32 %v1604_v58, %v1556_v12  ;;  %v1392_v30 = vmul.f32 0.0078125, %v1358_v2  ;;  %v1454_v62 = vsub.f32 %v2841_v54, %v2970_v43 }
 0x1f3   :  { %2281 = verf.f32 %v1575_v7  ;;  %v1576_v20 = vmul.f32 0.70710677, %v2997_v32  ;;  %v1499_v8 = vmul.f32 %v2272_v45, %v1451_v53  ;;  %v1312_v11 = vpop.xlane.xlu0 %1311  ;;  %v1423_v48 = vsub.f32 %v1391_v10, %v1407_v25 }
 0x1f4   :  { %v2274_v21 = vpop.eup %2273  ;;  %1636 = vst [vmem:[#allocation2 + $0x18] sm:$0xff] %v1620_v49  ;;  %2283 = vrsqrt.f32 %v1470_v47  ;;  %v1424_v60 = vsub.f32 %v1392_v30, %v1408_v31  ;;  %v3013_v34 = vmul.f32 0.0078125, %v1312_v11  ;;  %v1559_v7 = vmul.f32 0.5, %v2990_v37 }
 0x1f5   :  { %v2276_v0 = vpop.eup %2275  ;;  %2285 = verf.f32 %v1576_v20  ;;  %v1522_v28 = vmul.f32 %v2908_v50, %v1499_v8  ;;  %v1500_v36 = vmul.f32 %v2274_v21, %v1452_v4  ;;  %v1314_v39 = vpop.xlane.xlu1 %1313  ;;  %v1439_v24 = vmax.f32 %v1423_v48, 0.0 }
 0x1f6   :  { %v1605_v55 = vadd.f32 1.0, %v2276_v0  ;;  %v3015_v52 = vmul.f32 0.0078125, %v1314_v39  ;;  %v1440_v61 = vmax.f32 %v1424_v60, 0.0  ;;  %v1409_v12 = vmul.f32 %v3013_v34, %v3013_v34 }
 0x1f7   :  { %v2278_v59 = vpop.eup %2277  ;;  %v1545_v1 = vadd.f32 %v2915_v42, %v1522_v28  ;;  %v1523_v18 = vmul.f32 %v2908_v50, %v1500_v36  ;;  %v1471_v26 = vadd.f32 1e-05, %v1439_v24  ;;  %v1360_v6 = vpop.xlane.xlu0 %1359  ;;  %v1560_v47 = vmul.f32 0.5, %v2997_v32 }
 0x1f8   :  { %v1621_v44 = vmul.f32 %v1605_v55, %v1557_v27  ;;  %v1606_v16 = vadd.f32 1.0, %v2278_v59  ;;  %v1472_v38 = vadd.f32 1e-05, %v1440_v61  ;;  %v1410_v56 = vmul.f32 %v3015_v52, %v3015_v52 }
 0x1f9   :  { %v1577_v3 = vmul.f32 0.70710677, %v1545_v1  ;;  %v1546_v46 = vadd.f32 %v2915_v42, %v1523_v18  ;;  %v1362_v19 = vpop.xlane.xlu1 %1361  ;;  %2287 = vrsqrt.f32 %v1471_v26  ;;  %v1393_v9 = vmul.f32 0.0078125, %v1360_v6 }
 0x1fa   :  { %v2280_v57 = vpop.eup %2279  ;;  %1637 = vst [vmem:[#allocation2 + $0x20] sm:$0xff] %v1621_v44  ;;  %v1622_v5 = vmul.f32 %v1606_v16, %v1558_v40  ;;  %v1394_v13 = vmul.f32 0.0078125, %v1362_v19  ;;  %v1455_v32 = vsub.f32 %v2854_v22, %v2986_v33  ;;  %v1456_v28 = vsub.f32 %v2852_v15, %v2993_v35 }
 0x1fb   :  { %2289 = verf.f32 %v1577_v3  ;;  %v1578_v17 = vmul.f32 0.70710677, %v1546_v46  ;;  %v1501_v14 = vmul.f32 %v2280_v57, %v1453_v23  ;;  %v1425_v2 = vsub.f32 %v1393_v9, %v1409_v12 }
 0x1fc   :  { %1638 = vst [vmem:[#allocation2 + $0x28] sm:$0xff] %v1622_v5  ;;  %2291 = vrsqrt.f32 %v1472_v38  ;;  %v1426_v45 = vsub.f32 %v1394_v13, %v1410_v56  ;;  %v1561_v55 = vmul.f32 0.5, %v1545_v1  ;;  %v1562_v22 = vmul.f32 0.5, %v1546_v46 }
 0x1fd   :  { %v2282_v63 = vpop.eup %2281  ;;  %2293 = verf.f32 %v1578_v17  ;;  %v1524_v58 = vmul.f32 %v2908_v50, %v1501_v14  ;;  %v1441_v8 = vmax.f32 %v1425_v2, 0.0  ;;  %v1457_v3 = vsub.f32 %v2864_v51, %v3013_v34 }
 0x1fe   :  { %v2284_v29 = vpop.eup %2283  ;;  %v1607_v53 = vadd.f32 1.0, %v2282_v63  ;;  %v1442_v11 = vmax.f32 %v1426_v45, 0.0  ;;  %v1458_v19 = vsub.f32 %v2859_v41, %v3015_v52 }
 0x1ff   :  { %v2286_v49 = vpop.eup %2285  ;;  %v1547_v25 = vadd.f32 %v2915_v42, %v1524_v58  ;;  %v1502_v10 = vmul.f32 %v2284_v29, %v1454_v62  ;;  %v1473_v31 = vadd.f32 1e-05, %v1441_v8 }
 0x200   :  { %v1623_v20 = vmul.f32 %v1607_v53, %v1559_v7  ;;  %v1608_v4 = vadd.f32 1.0, %v2286_v49  ;;  %v1474_v37 = vadd.f32 1e-05, %v1442_v11 }
 0x201   :  { %v1579_v21 = vmul.f32 0.70710677, %v1547_v25  ;;  %v1525_v54 = vmul.f32 %v2908_v50, %v1502_v10  ;;  %v1563_v6 = vmul.f32 0.5, %v1547_v25 }
 0x202   :  { %1639 = vst [vmem:[#allocation2 + $0x30] sm:$0xff] %v1623_v20  ;;  %v1624_v43 = vmul.f32 %v1608_v4, %v1560_v47 }
 0x203   :  { %2295 = verf.f32 %v1579_v21  ;;  %v1548_v48 = vadd.f32 %v2915_v42, %v1525_v54  ;;  %v2288_v30 = vpop.eup %2287 }
 0x204   :  { %1640 = vst [vmem:[#allocation2 + $0x38] sm:$0xff] %v1624_v43  ;;  %2297 = vrsqrt.f32 %v1473_v31  ;;  %v1503_v36 = vmul.f32 %v2288_v30, %v1455_v32 }
 0x205   :  { %v2290_v0 = vpop.eup %2289  ;;  %v1580_v27 = vmul.f32 0.70710677, %v1548_v48  ;;  %2299 = vrsqrt.f32 %v1474_v37  ;;  %v1564_v56 = vmul.f32 0.5, %v1548_v48 }
 0x206   :  { %v2292_v39 = vpop.eup %2291  ;;  %v1609_v40 = vadd.f32 1.0, %v2290_v0  ;;  %v1526_v60 = vmul.f32 %v2908_v50, %v1503_v36 }
 0x207   :  { %v2294_v24 = vpop.eup %2293  ;;  %2301 = verf.f32 %v1580_v27  ;;  %v1504_v59 = vmul.f32 %v2292_v39, %v1456_v28 }
 0x208   :  { %v1625_v18 = vmul.f32 %v1609_v40, %v1561_v55  ;;  %v1610_v33 = vadd.f32 1.0, %v2294_v24  ;;  %v1549_v44 = vadd.f32 %v2915_v42, %v1526_v60 }
 0x209   :  { %v1527_v16 = vmul.f32 %v2908_v50, %v1504_v59 }
 0x20a   :  { %1641 = vst [vmem:[#allocation2 + $0x40] sm:$0xff] %v1625_v18  ;;  %v1626_v26 = vmul.f32 %v1610_v33, %v1562_v22  ;;  %v1581_v15 = vmul.f32 0.70710677, %v1549_v44  ;;  %v1565_v58 = vmul.f32 0.5, %v1549_v44 }
 0x20b   :  { %v1550_v35 = vadd.f32 %v2915_v42, %v1527_v16 }
 0x20c   :  { %1642 = vst [vmem:[#allocation2 + $0x48] sm:$0xff] %v1626_v26  ;;  %2303 = verf.f32 %v1581_v15 }
 0x20d   :  { %v2296_v1 = vpop.eup %2295  ;;  %v1582_v61 = vmul.f32 0.70710677, %v1550_v35  ;;  %v1566_v2 = vmul.f32 0.5, %v1550_v35 }
 0x20e   :  { %v2298_v23 = vpop.eup %2297  ;;  %v1611_v46 = vadd.f32 1.0, %v2296_v1 }
 0x20f   :  { %v2300_v57 = vpop.eup %2299  ;;  %2305 = verf.f32 %v1582_v61  ;;  %v1505_v5 = vmul.f32 %v2298_v23, %v1457_v3 }
 0x210   :  { %v1627_v38 = vmul.f32 %v1611_v46, %v1563_v6  ;;  %v1506_v17 = vmul.f32 %v2300_v57, %v1458_v19 }
 0x211   :  { %v2302_v14 = vpop.eup %2301  ;;  %v1528_v12 = vmul.f32 %v2908_v50, %v1505_v5 }
 0x212   :  { %1643 = vst [vmem:[#allocation2 + $0x50] sm:$0xff] %v1627_v38  ;;  %v1612_v9 = vadd.f32 1.0, %v2302_v14  ;;  %v1529_v13 = vmul.f32 %v2908_v50, %v1506_v17 }
 0x213   :  { %v1551_v51 = vadd.f32 %v2915_v42, %v1528_v12 }
 0x214   :  { %v1628_v34 = vmul.f32 %v1612_v9, %v1564_v56  ;;  %v1552_v63 = vadd.f32 %v2915_v42, %v1529_v13 }
 0x215   :  { %v1583_v62 = vmul.f32 0.70710677, %v1551_v51  ;;  %v1567_v25 = vmul.f32 0.5, %v1551_v51 }
 0x216   :  { %1644 = vst [vmem:[#allocation2 + $0x58] sm:$0xff] %v1628_v34  ;;  %v1584_v41 = vmul.f32 0.70710677, %v1552_v63  ;;  %v2304_v52 = vpop.eup %2303  ;;  %v1568_v42 = vmul.f32 0.5, %v1552_v63 }
 0x217   :  { %2307 = verf.f32 %v1583_v62  ;;  %v1613_v29 = vadd.f32 1.0, %v2304_v52 }
 0x218   :  { %2309 = verf.f32 %v1584_v41 }
 0x219   :  { %v2306_v7 = vpop.eup %2305  ;;  %v1629_v53 = vmul.f32 %v1613_v29, %v1565_v58 }
 0x21a   :  { %v1614_v45 = vadd.f32 1.0, %v2306_v7 }
 0x21b   :  { %1645 = vst [vmem:[#allocation2 + $0x60] sm:$0xff] %v1629_v53 }
 0x21c   :  { %v1630_v49 = vmul.f32 %v1614_v45, %v1566_v2 }
 0x21e   :  { %1646 = vst [vmem:[#allocation2 + $0x68] sm:$0xff] %v1630_v49 }
 0x221   :  { %v2308_v50 = vpop.eup %2307 }
 0x222   :  { %v2310_v47 = vpop.eup %2309  ;;  %v1615_v10 = vadd.f32 1.0, %v2308_v50 }
 0x223   :  { %v1616_v20 = vadd.f32 1.0, %v2310_v47 }
 0x224   :  { %v1631_v4 = vmul.f32 %v1615_v10, %v1567_v25 }
 0x225   :  { %v1632_v8 = vmul.f32 %v1616_v20, %v1568_v42 }
 0x226   :  { %1647 = vst [vmem:[#allocation2 + $0x70] sm:$0xff] %v1631_v4 }
 0x227   :  { %1648 = vst [vmem:[#allocation2 + $0x78] sm:$0xff] %v1632_v8 }
 0x228   :  { %2322 = shalt.err (!%p2319_p4)
}
 0x229   :  { %s2323_s21 = scalar_lea.hbm %s3065_s5, 2048 }
 0x22a   :  { %p2324_p5 = scmp.ne.s32.totalorder %s3065_s5, %s2323_s21  ;;  %p2327_p6 = scmp.lt.u32.totalorder %s2323_s21, %s3065_s5 }
 0x22c   :  { %p2329_p7 = pnand %p2327_p6, %p2324_p5 }
 0x22e   :  { %2332 = shalt.err (!%p2329_p7)
}
 0x22f   :  { %s2336_s26 = smov 128   ;;  %s2337_s27 = smov 8  }
 0x230   :  { %1660 = dma.vmem_to_hbm [thread:$0]  %s1655_s4, 2048, %s3065_s5, [#allocation3], %s2336_s26, %s2336_s26, %s2337_s27  }
 0x231   :  { %2333 = dma.done.wait [#allocation3], 2048  }
 0x232   :  { %2334 = vsyncadd [#allocation3], 4294965248 }
 0x233   :  { %1664 = vsyncpa [#allocation3], 1 }

</bundles_post_ra>
